<compile_context>
chip_gen: v5e
topology: v5e:2x2
jax: 0.10.0
libtpu: 0.0.40
codegen_flags: <defaults>
</compile_context>

<pallas_src>
import functools
import math

import jax
import jax.numpy as jnp
from jax.experimental import pallas as pl
from jax.experimental.pallas import tpu as pltpu


def _build_pe(d_model: int, max_len: int = 3000, dtype=jnp.float32) -> jnp.ndarray:
    """Deterministic positional-encoding table, shape [max_len, 1, d_model]."""
    position = jnp.arange(max_len, dtype=jnp.float32)[:, None]            # [max_len, 1]
    div_term = jnp.exp(
        jnp.arange(0, d_model, 2, dtype=jnp.float32) * (-math.log(10000.0) / d_model)
    )                                                                      # [d_model/2]
    angles = position * div_term                                           # [max_len, d_model/2]
    pe = jnp.zeros((max_len, d_model), dtype=jnp.float32)
    pe = pe.at[:, 0::2].set(jnp.sin(angles))
    pe = pe.at[:, 1::2].set(jnp.cos(angles))
    return pe[:, None, :].astype(dtype)                                    # [max_len, 1, d_model]


def _pe_add_kernel(x_ref, pe_ref, o_ref, *, batch: int):
    # x_ref / o_ref: (TS, B*D) lane-dense slab; pe_ref: (TS, D).
    pe_tile = pe_ref[...]
    if batch > 1:
        # Widen pe along lanes so column b*D + d holds pe[:, d].
        pe_tile = jnp.tile(pe_tile, (1, batch))
    o_ref[...] = x_ref[...] + pe_tile


def _choose_seq_tile(S: int, fused_width: int, pe_width: int,
                     itemsize: int, vmem_budget: int) -> int:
    """Pick a sequence tile (multiple of 8) that fits the VMEM budget.

    Returns 0 if even an 8-row tile would blow the budget (caller falls back
    to plain XLA).
    """
    # Per sequence row resident in VMEM: x block + out block + pe block,
    # each double-buffered by the BlockSpec pipeline.
    per_row = 2 * (2 * fused_width + pe_width) * itemsize
    max_rows = vmem_budget // max(per_row, 1)
    if max_rows < 8:
        return 0
    ts = (max_rows // 8) * 8
    if S >= 16:
        # Keep at least two grid steps so the "parallel" axis can shard
        # across both TensorCores on v7x.
        ts = min(ts, ((S // 2 + 7) // 8) * 8)
    if ts >= S and S % 8 == 0:
        return S
    return max(8, min(ts, (S // 8) * 8))


def positional_encoding_forward(x: jnp.ndarray, pe: jnp.ndarray, *,
                                force_pallas: bool = False,
                                vmem_budget: int = 24 << 20) -> jnp.ndarray:
    """x: [S, B, D]; pe: [max_len, 1, D].  Returns x + pe[:S] (eval-mode dropout)."""
    S, B, D = x.shape
    assert pe.ndim == 3 and pe.shape[1] == 1 and pe.shape[2] == D
    assert S <= pe.shape[0]

    # Cast pe once in the wrapper so the kernel add runs in x's dtype
    # (and pe DMA is half-width when x is bf16).
    pe = pe.astype(x.dtype)

    itemsize = jnp.dtype(x.dtype).itemsize
    total_bytes = S * B * D * itemsize
    if (not force_pallas and total_bytes < (1 << 20)) or S < 8:
        # Tiny: launch overhead dominates — let XLA fuse the broadcast add.
        return x + pe[:S]

    fused = B * D
    TS = _choose_seq_tile(S, fused, D, itemsize, vmem_budget)
    if TS == 0:
        # A single 8-row slab would not fit VMEM — let XLA handle it.
        return x + pe[:S]

    # Free, contiguous reshapes (no data movement): lane-dense 2-D views.
    x2 = x.reshape(S, fused)
    pe2 = pe.reshape(pe.shape[0], D)   # full table; BlockSpec picks pe[:S] blocks

    grid = (pl.cdiv(S, TS),)

    cost = pl.CostEstimate(
        flops=S * fused,
        transcendentals=0,
        bytes_accessed=2 * S * fused * itemsize + S * D * itemsize,
    )

    out2 = pl.pallas_call(
        functools.partial(_pe_add_kernel, batch=B),
        out_shape=jax.ShapeDtypeStruct((S, fused), x.dtype),
        grid_spec=pltpu.PrefetchScalarGridSpec(
            num_scalar_prefetch=0,
            grid=grid,
            in_specs=[
                pl.BlockSpec((TS, fused), lambda i: (i, 0)),  # x slab
                pl.BlockSpec((TS, D), lambda i: (i, 0)),      # pe rows (no wrapper slice)
            ],
            out_specs=pl.BlockSpec((TS, fused), lambda i: (i, 0)),
        ),
        compiler_params=pltpu.CompilerParams(
            dimension_semantics=("parallel",),
            vmem_limit_bytes=32 << 20,   # safe on v5e/v6e (128 MiB) and v7x (64 MiB) physical
        ),
        cost_estimate=cost,
    )(x2, pe2)

    return out2.reshape(S, B, D)


if __name__ == "__main__":
    MAX_LEN = 3000
    key = jax.random.PRNGKey(0)

    # Case 1: small shapes consistent with the module: seq=8, batch=2, d_model=32.
    S, B, D = 8, 2, 32
    k1, k2 = jax.random.split(key)
    x_small = jax.random.normal(k1, (S, B, D), dtype=jnp.float32)
    pe_small = _build_pe(D, max_len=MAX_LEN, dtype=jnp.float32)
    out_small = positional_encoding_forward(x_small, pe_small, force_pallas=True)
    out_small = jax.block_until_ready(out_small)
    ref_small = x_small + pe_small[:S]
    assert out_small.shape == (S, B, D)
    assert jnp.allclose(out_small, ref_small, atol=1e-6), "small-case mismatch vs reference"

    # Case 2: larger shape exercising multi-block sequence tiling
    # (grid has >= 2 parallel steps) while pe stays un-sliced in HBM.
    S2, B2, D2 = 256, 4, 128
    x_big = jax.random.normal(k2, (S2, B2, D2), dtype=jnp.float32)
    pe_big = _build_pe(D2, max_len=MAX_LEN, dtype=jnp.float32)
    out_big = positional_encoding_forward(x_big, pe_big, force_pallas=True)
    out_big = jax.block_until_ready(out_big)
    ref_big = x_big + pe_big[:S2]
    assert out_big.shape == (S2, B2, D2)
    assert jnp.allclose(out_big, ref_big, atol=1e-6), "large-case mismatch vs reference"

    print("KERNEL_OK")
</pallas_src>

<mosaic_0001>
module attributes {stable_mosaic.version = 11 : i64} {
  func.func @_pe_add_kernel(%arg0: i32, %arg1: memref<8x64xf32, #tpu.memory_space<vmem>>, %arg2: memref<8x32xf32, #tpu.memory_space<vmem>>, %arg3: memref<8x64xf32, #tpu.memory_space<vmem>>) attributes {dimension_semantics = [#tpu.dimension_semantics<parallel>], iteration_bounds = array<i64: 1>, scalar_prefetch = 0 : i64, scratch_operands = 0 : i64, tpu.core_type = #tpu.core_type<tc>, window_params = [{transform_indices = @transform_0, window_bounds = array<i64: 8, 64>}, {transform_indices = @transform_1, window_bounds = array<i64: 8, 32>}, {transform_indices = @transform_2, window_bounds = array<i64: 8, 64>}]} {
    %c0 = arith.constant 0 : index
    %c0_0 = arith.constant 0 : index
    %0 = vector.load %arg2[%c0, %c0_0] : memref<8x32xf32, #tpu.memory_space<vmem>>, vector<8x32xf32>
    %1 = tpu.concatenate %0, %0 in 1 : vector<8x32xf32>, vector<8x32xf32> -> vector<8x64xf32>
    %c0_1 = arith.constant 0 : index
    %c0_2 = arith.constant 0 : index
    %2 = vector.load %arg1[%c0_1, %c0_2] : memref<8x64xf32, #tpu.memory_space<vmem>>, vector<8x64xf32>
    %3 = arith.addf %2, %1 : vector<8x64xf32>
    %c0_3 = arith.constant 0 : index
    %c0_4 = arith.constant 0 : index
    %4 = vector.load %arg3[%c0_3, %c0_4] : memref<8x64xf32, #tpu.memory_space<vmem>>, vector<8x64xf32>
    tpu.vector_store %arg3[%c0_3, %c0_4], %3 {strides = array<i32>} : memref<8x64xf32, #tpu.memory_space<vmem>>, vector<8x64xf32>,
    return
  }
  func.func @transform_0(%arg0: i32) -> (i32, i32) {
    %c0_i32 = arith.constant 0 : i32
    %c0_i32_0 = arith.constant 0 : i32
    return %arg0, %c0_i32 : i32, i32
  }
  func.func @transform_1(%arg0: i32) -> (i32, i32) {
    %c0_i32 = arith.constant 0 : i32
    %c0_i32_0 = arith.constant 0 : i32
    return %arg0, %c0_i32 : i32, i32
  }
  func.func @transform_2(%arg0: i32) -> (i32, i32) {
    %c0_i32 = arith.constant 0 : i32
    %c0_i32_0 = arith.constant 0 : i32
    return %arg0, %c0_i32 : i32, i32
  }
}

</mosaic_0001>

<bundles_post_ra>
// kernel: tpu_custom_call.1
= control target key start
LH: loop header
LB: loop body
LE: loop exit
PB: predicated region body
PF: predicated region fallthrough
CT: control target
= control target key end

     0   :  { %s93_s0 = inlined_call_operand.vmem [shape: f32[8,64], index: 0, kind: input, shape index: {}]   ;;  %s94_s1 = inlined_call_operand.vmem [shape: f32[3000,32], index: 1, kind: input, shape index: {}]   ;;  %s95_s2 = inlined_call_operand.hbm [shape: f32[8,64], index: 2, kind: output, shape index: {}]  }
   0x1   :  { %v12_v0 = vld [vmem:[%s94_s1] sm:$0xff] }
   0x2   :  { %7 = vsyncpa [#allocation3], 0  ;;  %s67_s11 = smov 32   ;;  %vm17_vm0 = vcmask 261120   ;;  %v19_v1 = vld [vmem:[%s93_s0] sm:$0xff]  ;;  %s68_s14 = smov [#allocation2]  }
   0x3   :  { %14 = vrot.lane.b32.xlu0 %v12_v0, %s67_s11  ;;  %s28_s15 = sshll.u32 %s68_s14, 4  ;;  %s30_s18 = sshll.u32 %s95_s2, 4  ;;  %vm21_vm1 = vcmask 523264   ;;  %s29_s15 = int_to_ptr.vmem [resolvable:$true] %s28_s15  ;;  %s31_s18 = int_to_ptr.hbm [resolvable:$true] %s30_s18 }
  0x75   :  { %v15_v2 = vpop.permute.xlu0 %14 }
  0x76   :  { %v18_v3 = vsel %vm17_vm0, %v12_v0, %v15_v2 }
  0x77   :  { %v20_v4 = vadd.f32 %v19_v1, %v18_v3 }
  0x79   :  { %22 = vst.msk [vmem:[#allocation2] sm:$0xff] %vm21_vm1, %v20_v4 }
  0x7a   :  { %33 = dma.vmem_to_hbm [thread:$0]  %s29_s15, 128, %s31_s18, [#allocation3]  }
  0x7b   :  { %65 = dma.done.wait [#allocation3], 128  }
  0x7c   :  { %66 = vsyncadd [#allocation3], 4294967168 }
  0x7d   :  { %38 = vsyncpa [#allocation3], 1 }

</bundles_post_ra>
